<compile_context>
chip_gen: v6e
topology: v6e:2x2x1
jax: 0.10.0
libtpu: 0.0.40
codegen_flags: <defaults>
</compile_context>

<pallas_src>
import functools

import jax
import jax.numpy as jnp
from jax.experimental import pallas as pl
from jax.experimental.pallas import tpu as pltpu


# ----------------------------------------------------------------------------
# Fully fused forward: all Linears + BN(train) + Mish in one kernel body.
# Ref order: x, then per layer (w, b[, gamma, beta]), then the output ref.
# ----------------------------------------------------------------------------
def _fused_generator_kernel(*refs, n_layers, eps):
    x_ref = refs[0]
    o_ref = refs[-1]
    param_refs = refs[1:-1]

    h = x_ref[...].astype(jnp.float32)

    idx = 0
    for layer in range(n_layers):
        w = param_refs[idx][...]
        b = param_refs[idx + 1][...]          # (1, N) row, broadcasts on VPU
        idx += 2

        # Linear: MXU matmul with f32 accumulation, bias add in the epilogue.
        h = jnp.dot(h, w, preferred_element_type=jnp.float32) + b

        if layer < n_layers - 1:
            gamma = param_refs[idx][...]      # (1, N)
            beta = param_refs[idx + 1][...]   # (1, N)
            idx += 2

            # BatchNorm1d, training mode: biased batch statistics.
            mean = jnp.mean(h, axis=0, keepdims=True)
            var = jnp.mean((h - mean) ** 2, axis=0, keepdims=True)
            y = gamma * (h - mean) * jax.lax.rsqrt(var + eps) + beta

            # Mish(y) = y * tanh(softplus(y)) with PyTorch's threshold=20.
            # Single EUP transcendental: tanh(log(1+e)) == (t^2-1)/(t^2+1).
            e = jnp.exp(jnp.minimum(y, 20.0))
            t2 = (1.0 + e) * (1.0 + e)
            h = jnp.where(y > 20.0, y, y * (t2 - 1.0) / (t2 + 1.0))

    o_ref[...] = h.astype(o_ref.dtype)


def generator_forward(params, x, eps=1e-5):
    """Fused Pallas forward.  x: (B, dimensions[0]) float32."""
    B = x.shape[0]
    n_layers = len(params)
    n_out = params[-1]["w"].shape[1]

    # Lane-dense output: pad the final Linear's columns up to a multiple of 128
    # so the store is an unmasked full-lane vst; slice the real width outside.
    n_pad = max(128, ((n_out + 127) // 128) * 128)

    inputs = [x]
    footprint = x.size * 4
    for i, layer in enumerate(params):
        w, b = layer["w"], layer["b"]
        if i == n_layers - 1 and n_pad != n_out:
            w = jnp.pad(w, ((0, 0), (0, n_pad - n_out)))
            b = jnp.pad(b, ((0, n_pad - n_out),))
        inputs.append(w)
        inputs.append(b.reshape(1, -1))
        footprint += w.size * 4 + b.size * 4 + B * w.shape[1] * 4
        if "gamma" in layer:
            inputs.append(layer["gamma"].reshape(1, -1))
            inputs.append(layer["beta"].reshape(1, -1))
            footprint += 2 * layer["gamma"].size * 4

    # Single-block fusion is only valid while everything fits in VMEM
    # (conservative bound well under the default scoped limit on all gens).
    assert footprint < 8 * 1024 * 1024, (
        "Generator too large for the fully-fused single-block kernel; "
        "a batch/feature-tiled path is required."
    )

    out_padded = pl.pallas_call(
        functools.partial(_fused_generator_kernel, n_layers=n_layers, eps=eps),
        out_shape=jax.ShapeDtypeStruct((B, n_pad), x.dtype),
    )(*inputs)

    return out_padded[:, :n_out]


# ----------------------------------------------------------------------------
# Parameter setup (mimics nn.Linear's U(-1/sqrt(fan_in), +) and BN's (1, 0)).
# ----------------------------------------------------------------------------
def init_generator_params(key, dimensions):
    params = []
    n_layers = len(dimensions) - 1
    for i, (c_in, c_out) in enumerate(zip(dimensions[:-1], dimensions[1:])):
        key, kw, kb = jax.random.split(key, 3)
        bound = 1.0 / jnp.sqrt(float(c_in))
        w = jax.random.uniform(kw, (c_in, c_out), jnp.float32, -bound, bound)
        b = jax.random.uniform(kb, (c_out,), jnp.float32, -bound, bound)
        layer = {"w": w, "b": b}
        if i < n_layers - 1:
            layer["gamma"] = jnp.ones((c_out,), jnp.float32)
            layer["beta"] = jnp.zeros((c_out,), jnp.float32)
        params.append(layer)
    return params


def generator_forward_ref(params, x):
    """Pure-JAX reference (mirrors the PyTorch forward in train mode)."""
    h = x
    for layer in params:
        h = h @ layer["w"] + layer["b"]
        if "gamma" in layer:
            mean = jnp.mean(h, axis=0, keepdims=True)
            var = jnp.mean((h - mean) ** 2, axis=0, keepdims=True)
            h = layer["gamma"] * (h - mean) * jax.lax.rsqrt(var + 1e-5) + layer["beta"]
            sp = jnp.where(h > 20.0, h, jnp.log1p(jnp.exp(jnp.minimum(h, 20.0))))
            h = h * jnp.tanh(sp)
    return h


if __name__ == "__main__":
    dimensions = [128, 256, 128, 32]   # z_dim=128 -> 256 -> 128 -> 32
    batch = 8

    key = jax.random.PRNGKey(0)
    key, kx = jax.random.split(key)
    params = init_generator_params(key, dimensions)
    x = jax.random.normal(kx, (batch, dimensions[0]), jnp.float32)

    fwd = jax.jit(generator_forward)
    out = jax.block_until_ready(fwd(params, x))

    ref = generator_forward_ref(params, x)
    assert out.shape == (batch, dimensions[-1])
    assert jnp.allclose(out, ref, atol=1e-4, rtol=1e-4), "mismatch vs reference"

    print("KERNEL_OK")
</pallas_src>

<mosaic_0001>
module attributes {stable_mosaic.version = 11 : i64} {
  func.func @_fused_generator_kernel(%arg0: memref<8x128xf32, #tpu.memory_space<vmem>>, %arg1: memref<128x256xf32, #tpu.memory_space<vmem>>, %arg2: memref<1x256xf32, #tpu.memory_space<vmem>>, %arg3: memref<1x256xf32, #tpu.memory_space<vmem>>, %arg4: memref<1x256xf32, #tpu.memory_space<vmem>>, %arg5: memref<256x128xf32, #tpu.memory_space<vmem>>, %arg6: memref<1x128xf32, #tpu.memory_space<vmem>>, %arg7: memref<1x128xf32, #tpu.memory_space<vmem>>, %arg8: memref<1x128xf32, #tpu.memory_space<vmem>>, %arg9: memref<128x128xf32, #tpu.memory_space<vmem>>, %arg10: memref<1x128xf32, #tpu.memory_space<vmem>>, %arg11: memref<8x128xf32, #tpu.memory_space<vmem>>) attributes {dimension_semantics = [], scalar_prefetch = 0 : i64, scratch_operands = 0 : i64, tpu.core_type = #tpu.core_type<tc>} {
    %c0 = arith.constant 0 : index
    %c0_0 = arith.constant 0 : index
    %0 = vector.load %arg0[%c0, %c0_0] : memref<8x128xf32, #tpu.memory_space<vmem>>, vector<8x128xf32>
    %c0_1 = arith.constant 0 : index
    %c0_2 = arith.constant 0 : index
    %1 = vector.load %arg1[%c0_1, %c0_2] : memref<128x256xf32, #tpu.memory_space<vmem>>, vector<128x256xf32>
    %c0_3 = arith.constant 0 : index
    %c0_4 = arith.constant 0 : index
    %2 = vector.load %arg2[%c0_3, %c0_4] : memref<1x256xf32, #tpu.memory_space<vmem>>, vector<1x256xf32>
    %cst = arith.constant dense<0.000000e+00> : vector<8x256xf32>
    %3 = tpu.matmul %0, %1, %cst {dimension_numbers = #tpu.dot_dimension_numbers<[1], [0], [0], [1], [0, 0, 1, 1], [], []>} : vector<8x128xf32>, vector<128x256xf32>, vector<8x256xf32> -> vector<8x256xf32>
    %4 = vector.broadcast %2 : vector<1x256xf32> to vector<8x256xf32>
    %5 = arith.addf %3, %4 : vector<8x256xf32>
    %c0_5 = arith.constant 0 : index
    %c0_6 = arith.constant 0 : index
    %6 = vector.load %arg3[%c0_5, %c0_6] : memref<1x256xf32, #tpu.memory_space<vmem>>, vector<1x256xf32>
    %c0_7 = arith.constant 0 : index
    %c0_8 = arith.constant 0 : index
    %7 = vector.load %arg4[%c0_7, %c0_8] : memref<1x256xf32, #tpu.memory_space<vmem>>, vector<1x256xf32>
    %cst_9 = arith.constant dense<0.000000e+00> : vector<256xf32>
    %8 = vector.multi_reduction <add>, %5, %cst_9 [0] : vector<8x256xf32> to vector<256xf32>
    %9 = vector.shape_cast %8 : vector<256xf32> to vector<1x256xf32>
    %cst_10 = arith.constant 8.000000e+00 : f32
    %10 = vector.broadcast %cst_10 : f32 to vector<1x256xf32>
    %11 = arith.divf %9, %10 : vector<1x256xf32>
    %12 = vector.broadcast %11 : vector<1x256xf32> to vector<8x256xf32>
    %13 = arith.subf %5, %12 : vector<8x256xf32>
    %14 = arith.mulf %13, %13 : vector<8x256xf32>
    %cst_11 = arith.constant dense<0.000000e+00> : vector<256xf32>
    %15 = vector.multi_reduction <add>, %14, %cst_11 [0] : vector<8x256xf32> to vector<256xf32>
    %16 = vector.shape_cast %15 : vector<256xf32> to vector<1x256xf32>
    %cst_12 = arith.constant 8.000000e+00 : f32
    %17 = vector.broadcast %cst_12 : f32 to vector<1x256xf32>
    %18 = arith.divf %16, %17 : vector<1x256xf32>
    %19 = vector.broadcast %11 : vector<1x256xf32> to vector<8x256xf32>
    %20 = arith.subf %5, %19 : vector<8x256xf32>
    %21 = vector.broadcast %6 : vector<1x256xf32> to vector<8x256xf32>
    %22 = arith.mulf %21, %20 : vector<8x256xf32>
    %cst_13 = arith.constant 9.99999974E-6 : f32
    %23 = vector.broadcast %cst_13 : f32 to vector<1x256xf32>
    %24 = arith.addf %18, %23 : vector<1x256xf32>
    %25 = math.rsqrt %24 : vector<1x256xf32>
    %26 = vector.broadcast %25 : vector<1x256xf32> to vector<8x256xf32>
    %27 = arith.mulf %22, %26 : vector<8x256xf32>
    %28 = vector.broadcast %7 : vector<1x256xf32> to vector<8x256xf32>
    %29 = arith.addf %27, %28 : vector<8x256xf32>
    %cst_14 = arith.constant 2.000000e+01 : f32
    %30 = vector.broadcast %cst_14 : f32 to vector<8x256xf32>
    %31 = arith.minimumf %29, %30 : vector<8x256xf32>
    %32 = math.exp %31 : vector<8x256xf32>
    %cst_15 = arith.constant 1.000000e+00 : f32
    %33 = vector.broadcast %cst_15 : f32 to vector<8x256xf32>
    %34 = arith.addf %33, %32 : vector<8x256xf32>
    %cst_16 = arith.constant 1.000000e+00 : f32
    %35 = vector.broadcast %cst_16 : f32 to vector<8x256xf32>
    %36 = arith.addf %35, %32 : vector<8x256xf32>
    %37 = arith.mulf %34, %36 : vector<8x256xf32>
    %cst_17 = arith.constant 2.000000e+01 : f32
    %38 = vector.broadcast %cst_17 : f32 to vector<8x256xf32>
    %39 = arith.cmpf ogt, %29, %38 : vector<8x256xf32>
    %cst_18 = arith.constant 1.000000e+00 : f32
    %40 = vector.broadcast %cst_18 : f32 to vector<8x256xf32>
    %41 = arith.subf %37, %40 : vector<8x256xf32>
    %42 = arith.mulf %29, %41 : vector<8x256xf32>
    %cst_19 = arith.constant 1.000000e+00 : f32
    %43 = vector.broadcast %cst_19 : f32 to vector<8x256xf32>
    %44 = arith.addf %37, %43 : vector<8x256xf32>
    %45 = arith.divf %42, %44 : vector<8x256xf32>
    %46 = arith.select %39, %29, %45 : vector<8x256xi1>, vector<8x256xf32>
    %c0_20 = arith.constant 0 : index
    %c0_21 = arith.constant 0 : index
    %47 = vector.load %arg5[%c0_20, %c0_21] : memref<256x128xf32, #tpu.memory_space<vmem>>, vector<256x128xf32>
    %c0_22 = arith.constant 0 : index
    %c0_23 = arith.constant 0 : index
    %48 = vector.load %arg6[%c0_22, %c0_23] : memref<1x128xf32, #tpu.memory_space<vmem>>, vector<1x128xf32>
    %cst_24 = arith.constant dense<0.000000e+00> : vector<8x128xf32>
    %49 = tpu.matmul %46, %47, %cst_24 {dimension_numbers = #tpu.dot_dimension_numbers<[1], [0], [0], [1], [0, 0, 1, 1], [], []>} : vector<8x256xf32>, vector<256x128xf32>, vector<8x128xf32> -> vector<8x128xf32>
    %50 = vector.broadcast %48 : vector<1x128xf32> to vector<8x128xf32>
    %51 = arith.addf %49, %50 : vector<8x128xf32>
    %c0_25 = arith.constant 0 : index
    %c0_26 = arith.constant 0 : index
    %52 = vector.load %arg7[%c0_25, %c0_26] : memref<1x128xf32, #tpu.memory_space<vmem>>, vector<1x128xf32>
    %c0_27 = arith.constant 0 : index
    %c0_28 = arith.constant 0 : index
    %53 = vector.load %arg8[%c0_27, %c0_28] : memref<1x128xf32, #tpu.memory_space<vmem>>, vector<1x128xf32>
    %cst_29 = arith.constant dense<0.000000e+00> : vector<128xf32>
    %54 = vector.multi_reduction <add>, %51, %cst_29 [0] : vector<8x128xf32> to vector<128xf32>
    %55 = vector.shape_cast %54 : vector<128xf32> to vector<1x128xf32>
    %cst_30 = arith.constant 8.000000e+00 : f32
    %56 = vector.broadcast %cst_30 : f32 to vector<1x128xf32>
    %57 = arith.divf %55, %56 : vector<1x128xf32>
    %58 = vector.broadcast %57 : vector<1x128xf32> to vector<8x128xf32>
    %59 = arith.subf %51, %58 : vector<8x128xf32>
    %60 = arith.mulf %59, %59 : vector<8x128xf32>
    %cst_31 = arith.constant dense<0.000000e+00> : vector<128xf32>
    %61 = vector.multi_reduction <add>, %60, %cst_31 [0] : vector<8x128xf32> to vector<128xf32>
    %62 = vector.shape_cast %61 : vector<128xf32> to vector<1x128xf32>
    %cst_32 = arith.constant 8.000000e+00 : f32
    %63 = vector.broadcast %cst_32 : f32 to vector<1x128xf32>
    %64 = arith.divf %62, %63 : vector<1x128xf32>
    %65 = vector.broadcast %57 : vector<1x128xf32> to vector<8x128xf32>
    %66 = arith.subf %51, %65 : vector<8x128xf32>
    %67 = vector.broadcast %52 : vector<1x128xf32> to vector<8x128xf32>
    %68 = arith.mulf %67, %66 : vector<8x128xf32>
    %cst_33 = arith.constant 9.99999974E-6 : f32
    %69 = vector.broadcast %cst_33 : f32 to vector<1x128xf32>
    %70 = arith.addf %64, %69 : vector<1x128xf32>
    %71 = math.rsqrt %70 : vector<1x128xf32>
    %72 = vector.broadcast %71 : vector<1x128xf32> to vector<8x128xf32>
    %73 = arith.mulf %68, %72 : vector<8x128xf32>
    %74 = vector.broadcast %53 : vector<1x128xf32> to vector<8x128xf32>
    %75 = arith.addf %73, %74 : vector<8x128xf32>
    %cst_34 = arith.constant 2.000000e+01 : f32
    %76 = vector.broadcast %cst_34 : f32 to vector<8x128xf32>
    %77 = arith.minimumf %75, %76 : vector<8x128xf32>
    %78 = math.exp %77 : vector<8x128xf32>
    %cst_35 = arith.constant 1.000000e+00 : f32
    %79 = vector.broadcast %cst_35 : f32 to vector<8x128xf32>
    %80 = arith.addf %79, %78 : vector<8x128xf32>
    %cst_36 = arith.constant 1.000000e+00 : f32
    %81 = vector.broadcast %cst_36 : f32 to vector<8x128xf32>
    %82 = arith.addf %81, %78 : vector<8x128xf32>
    %83 = arith.mulf %80, %82 : vector<8x128xf32>
    %cst_37 = arith.constant 2.000000e+01 : f32
    %84 = vector.broadcast %cst_37 : f32 to vector<8x128xf32>
    %85 = arith.cmpf ogt, %75, %84 : vector<8x128xf32>
    %cst_38 = arith.constant 1.000000e+00 : f32
    %86 = vector.broadcast %cst_38 : f32 to vector<8x128xf32>
    %87 = arith.subf %83, %86 : vector<8x128xf32>
    %88 = arith.mulf %75, %87 : vector<8x128xf32>
    %cst_39 = arith.constant 1.000000e+00 : f32
    %89 = vector.broadcast %cst_39 : f32 to vector<8x128xf32>
    %90 = arith.addf %83, %89 : vector<8x128xf32>
    %91 = arith.divf %88, %90 : vector<8x128xf32>
    %92 = arith.select %85, %75, %91 : vector<8x128xi1>, vector<8x128xf32>
    %c0_40 = arith.constant 0 : index
    %c0_41 = arith.constant 0 : index
    %93 = vector.load %arg9[%c0_40, %c0_41] : memref<128x128xf32, #tpu.memory_space<vmem>>, vector<128x128xf32>
    %c0_42 = arith.constant 0 : index
    %c0_43 = arith.constant 0 : index
    %94 = vector.load %arg10[%c0_42, %c0_43] : memref<1x128xf32, #tpu.memory_space<vmem>>, vector<1x128xf32>
    %cst_44 = arith.constant dense<0.000000e+00> : vector<8x128xf32>
    %95 = tpu.matmul %92, %93, %cst_44 {dimension_numbers = #tpu.dot_dimension_numbers<[1], [0], [0], [1], [0, 0, 1, 1], [], []>} : vector<8x128xf32>, vector<128x128xf32>, vector<8x128xf32> -> vector<8x128xf32>
    %96 = vector.broadcast %94 : vector<1x128xf32> to vector<8x128xf32>
    %97 = arith.addf %95, %96 : vector<8x128xf32>
    %c0_45 = arith.constant 0 : index
    %c0_46 = arith.constant 0 : index
    %98 = vector.load %arg11[%c0_45, %c0_46] : memref<8x128xf32, #tpu.memory_space<vmem>>, vector<8x128xf32>
    tpu.vector_store %arg11[%c0_45, %c0_46], %97 {strides = array<i32>} : memref<8x128xf32, #tpu.memory_space<vmem>>, vector<8x128xf32>,
    return
  }
}

</mosaic_0001>

<bundles_post_ra>
// kernel: generator_forward.1
= control target key start
LH: loop header
LB: loop body
LE: loop exit
PB: predicated region body
PF: predicated region fallthrough
CT: control target
= control target key end

     0   :  { %16 = vsyncpa [#allocation3], 0  ;;  %s945_s0 = inlined_call_operand.vmem [shape: f32[8,128], index: 0, kind: input, shape index: {}]   ;;  %s946_s1 = inlined_call_operand.vmem [shape: f32[128,256], index: 1, kind: input, shape index: {}]   ;;  %s947_s2 = inlined_call_operand.vmem [shape: f32[1,256], index: 2, kind: input, shape index: {}]   ;;  %s948_s3 = inlined_call_operand.vmem [shape: f32[1,256], index: 3, kind: input, shape index: {}]   ;;  %s949_s4 = inlined_call_operand.vmem [shape: f32[1,256], index: 4, kind: input, shape index: {}]   ;;  %s950_s5 = inlined_call_operand.hbm [shape: f32[256,128], index: 5, kind: input, shape index: {}]   ;;  %s951_s6 = inlined_call_operand.vmem [shape: f32[1,128], index: 6, kind: input, shape index: {}]   ;;  %s952_s7 = inlined_call_operand.vmem [shape: f32[1,128], index: 7, kind: input, shape index: {}]   ;;  %s953_s8 = inlined_call_operand.vmem [shape: f32[1,128], index: 8, kind: input, shape index: {}]   ;;  %s954_s9 = inlined_call_operand.vmem [shape: f32[128,128], index: 9, kind: input, shape index: {}]   ;;  %s955_s10 = inlined_call_operand.vmem [shape: f32[1,128], index: 10, kind: input, shape index: {}]   ;;  %s956_s11 = inlined_call_operand.hbm [shape: f32[8,128], index: 11, kind: output, shape index: {}]  }
   0x1   :  { %17 = vsyncpa [#allocation4], 0  ;;  %s687_s17 = smov [#allocation2]  }
   0x2   :  { %s33_s18 = sshll.u32 %s687_s17, 4  ;;  %s34_s18 = int_to_ptr.vmem [resolvable:$true] %s33_s18 }
   0x3   :  { %s651_s19 = scalar_lea.vmem %s34_s18, 4096  ;;  %p656_p1 = scmp.lt.s32.totalorder %s34_s18, %s34_s18 }
   0x4   :  { %p652_p0 = scmp.ne.s32.totalorder %s34_s18, %s651_s19  ;;  %p657_p2 = scmp.lt.s32.totalorder %s651_s19, %s651_s19 }
   0x6   :  { %p658_p3 = por %p657_p2, %p656_p1 }
   0x8   :  { %p659_p4 = pnand %p658_p3, %p652_p0 }
   0xa   :  { %662 = shalt.err (!%p659_p4)
}
   0xb   :  { %s688_s20 = smov 128   ;;  %s689_s21 = smov 8  }
   0xc   :  { %39 = dma.hbm_to_vmem [thread:$0]  %s950_s5, 4096, %s34_s18, [#allocation3], %s688_s20, %s688_s20, %s689_s21  }
   0xd   :  { %683 = dma.done.wait [#allocation3], 4096  }
   0xe   :  { %684 = vsyncadd [#allocation3], 4294963200  ;;  %v690_v0 = vmov 0.0   ;;  %v85_v1 = vld [vmem:[%s946_s1 + $0xf8] sm:$0xff]  ;;  %v84_v2 = vld [vmem:[%s946_s1 + $0xf0] sm:$0xff]  ;;  %vm691_vm2 = vmmov 0  }
   0xf   :  { %162 = vmatprep.mubr.f32.mxu0 %v690_v0  ;;  %v83_v3 = vld [vmem:[%s946_s1 + $0xe8] sm:$0xff]  ;;  %98 = vmatprep.subr.mxu0 %v85_v1  ;;  %v82_v4 = vld [vmem:[%s946_s1 + $0xe0] sm:$0xff]  ;;  %v81_v5 = vld [vmem:[%s946_s1 + $0xd8] sm:$0xff] }
  0x10   :  { %99 = vmatpush1.msra.mxu0 %v84_v2  ;;  %v80_v6 = vld [vmem:[%s946_s1 + $0xd0] sm:$0xff]  ;;  %v79_v7 = vld [vmem:[%s946_s1 + $0xc8] sm:$0xff]  ;;  %v78_v8 = vld [vmem:[%s946_s1 + $0xc0] sm:$0xff] }
  0x11   :  { %100 = vmatprep.subr.mxu0 %v83_v3  ;;  %v77_v9 = vld [vmem:[%s946_s1 + $0xb8] sm:$0xff]  ;;  %v76_v10 = vld [vmem:[%s946_s1 + $0xb0] sm:$0xff]  ;;  %v75_v11 = vld [vmem:[%s946_s1 + $0xa8] sm:$0xff]  ;;  %v88_v3 = vlaneseq }
  0x12   :  { %101 = vmatpush1.msra.mxu0 %v82_v4  ;;  %v74_v12 = vld [vmem:[%s946_s1 + $0xa0] sm:$0xff]  ;;  %v73_v13 = vld [vmem:[%s946_s1 + $0x98] sm:$0xff]  ;;  %v72_v14 = vld [vmem:[%s946_s1 + $0x90] sm:$0xff] }
  0x13   :  { %102 = vmatprep.subr.mxu0 %v81_v5  ;;  %v71_v15 = vld [vmem:[%s946_s1 + $0x88] sm:$0xff]  ;;  %v70_v16 = vld [vmem:[%s946_s1 + $0x80] sm:$0xff]  ;;  %v69_v17 = vld [vmem:[%s946_s1 + $0x78] sm:$0xff]  ;;  %v89_v4 = vshrl.u32 %v88_v3, 7 }
  0x14   :  { %103 = vmatpush1.msra.mxu0 %v80_v6  ;;  %v68_v18 = vld [vmem:[%s946_s1 + $0x70] sm:$0xff]  ;;  %v67_v19 = vld [vmem:[%s946_s1 + $0x68] sm:$0xff]  ;;  %v66_v20 = vld [vmem:[%s946_s1 + $0x60] sm:$0xff] }
  0x15   :  { %104 = vmatprep.subr.mxu0 %v79_v7  ;;  %v65_v21 = vld [vmem:[%s946_s1 + $0x58] sm:$0xff]  ;;  %v64_v22 = vld [vmem:[%s946_s1 + $0x50] sm:$0xff]  ;;  %v63_v23 = vld [vmem:[%s946_s1 + $0x48] sm:$0xff]  ;;  %v90_v5 = vsub.s32 0, %v89_v4  ;;  %v94_v7 = vsub.s32 1, %v89_v4 }
  0x16   :  { %105 = vmatpush1.msra.mxu0 %v78_v8  ;;  %v62_v24 = vld [vmem:[%s946_s1 + $0x40] sm:$0xff]  ;;  %v61_v25 = vld [vmem:[%s946_s1 + $0x38] sm:$0xff]  ;;  %v60_v26 = vld [vmem:[%s946_s1 + $0x30] sm:$0xff] }
  0x17   :  { %106 = vmatprep.subr.mxu0 %v77_v9  ;;  %v59_v27 = vld [vmem:[%s946_s1 + $0x28] sm:$0xff]  ;;  %v58_v28 = vld [vmem:[%s946_s1 + $0x20] sm:$0xff]  ;;  %v57_v29 = vld [vmem:[%s946_s1 + $0x18] sm:$0xff] }
  0x18   :  { %107 = vmatpush1.msra.mxu0 %v76_v10  ;;  %v56_v30 = vld [vmem:[%s946_s1 + $0x10] sm:$0xff]  ;;  %v55_v31 = vld [vmem:[%s946_s1 + $0x8] sm:$0xff]  ;;  %v54_v32 = vld [vmem:[%s946_s1] sm:$0xff] }
  0x19   :  { %108 = vmatprep.subr.mxu0 %v75_v11  ;;  %v53_v33 = vld [vmem:[%s945_s0] sm:$0xff]  ;;  %v291_v34 = vld [vmem:[#allocation2 + $0xf8] sm:$0xff]  ;;  %v290_v36 = vld [vmem:[#allocation2 + $0xf0] sm:$0xff] }
  0x1a   :  { %109 = vmatpush1.msra.mxu0 %v74_v12  ;;  %v275_v35 = vld [vmem:[#allocation2 + $0x78] sm:$0xff]  ;;  %532 = vmatprep.subr.mxu1 %v291_v34  ;;  %v274_v37 = vld [vmem:[#allocation2 + $0x70] sm:$0xff]  ;;  %v289_v38 = vld [vmem:[#allocation2 + $0xe8] sm:$0xff] }
  0x1b   :  { %110 = vmatprep.subr.mxu0 %v73_v13  ;;  %533 = vmatpush3.msra.mxu1 %v275_v35  ;;  %v273_v39 = vld [vmem:[#allocation2 + $0x68] sm:$0xff]  ;;  %v288_v40 = vld [vmem:[#allocation2 + $0xe0] sm:$0xff]  ;;  %v287_v42 = vld [vmem:[#allocation2 + $0xd8] sm:$0xff] }
  0x1c   :  { %111 = vmatpush1.msra.mxu0 %v72_v14  ;;  %534 = vmatprep.subr.mxu1 %v290_v36  ;;  %v272_v41 = vld [vmem:[#allocation2 + $0x60] sm:$0xff]  ;;  %v271_v43 = vld [vmem:[#allocation2 + $0x58] sm:$0xff]  ;;  %v286_v44 = vld [vmem:[#allocation2 + $0xd0] sm:$0xff] }
  0x1d   :  { %112 = vmatprep.subr.mxu0 %v71_v15  ;;  %535 = vmatpush3.msra.mxu1 %v274_v37  ;;  %v270_v45 = vld [vmem:[#allocation2 + $0x50] sm:$0xff]  ;;  %v285_v46 = vld [vmem:[#allocation2 + $0xc8] sm:$0xff]  ;;  %v284_v48 = vld [vmem:[#allocation2 + $0xc0] sm:$0xff] }
  0x1e   :  { %113 = vmatpush1.msra.mxu0 %v70_v16  ;;  %536 = vmatprep.subr.mxu1 %v289_v38  ;;  %v269_v47 = vld [vmem:[#allocation2 + $0x48] sm:$0xff]  ;;  %v268_v49 = vld [vmem:[#allocation2 + $0x40] sm:$0xff]  ;;  %v283_v50 = vld [vmem:[#allocation2 + $0xb8] sm:$0xff] }
  0x1f   :  { %114 = vmatprep.subr.mxu0 %v69_v17  ;;  %537 = vmatpush3.msra.mxu1 %v273_v39  ;;  %v267_v51 = vld [vmem:[#allocation2 + $0x38] sm:$0xff]  ;;  %v282_v52 = vld [vmem:[#allocation2 + $0xb0] sm:$0xff]  ;;  %v281_v54 = vld [vmem:[#allocation2 + $0xa8] sm:$0xff] }
  0x20   :  { %115 = vmatpush1.msra.mxu0 %v68_v18  ;;  %538 = vmatprep.subr.mxu1 %v288_v40  ;;  %v266_v53 = vld [vmem:[#allocation2 + $0x30] sm:$0xff]  ;;  %v265_v55 = vld [vmem:[#allocation2 + $0x28] sm:$0xff]  ;;  %v280_v56 = vld [vmem:[#allocation2 + $0xa0] sm:$0xff] }
  0x21   :  { %116 = vmatprep.subr.mxu0 %v67_v19  ;;  %539 = vmatpush3.msra.mxu1 %v272_v41  ;;  %v264_v57 = vld [vmem:[#allocation2 + $0x20] sm:$0xff]  ;;  %v279_v58 = vld [vmem:[#allocation2 + $0x98] sm:$0xff]  ;;  %v278_v60 = vld [vmem:[#allocation2 + $0x90] sm:$0xff] }
  0x22   :  { %117 = vmatpush1.msra.mxu0 %v66_v20  ;;  %540 = vmatprep.subr.mxu1 %v287_v42  ;;  %v263_v59 = vld [vmem:[#allocation2 + $0x18] sm:$0xff]  ;;  %v262_v61 = vld [vmem:[#allocation2 + $0x10] sm:$0xff]  ;;  %v277_v62 = vld [vmem:[#allocation2 + $0x88] sm:$0xff] }
  0x23   :  { %118 = vmatprep.subr.mxu0 %v65_v21  ;;  %541 = vmatpush3.msra.mxu1 %v271_v43  ;;  %v261_v63 = vld [vmem:[#allocation2 + $0x8] sm:$0xff]  ;;  %v276_v1 = vld [vmem:[#allocation2 + $0x80] sm:$0xff] }
  0x24   :  { %119 = vmatpush1.msra.mxu0 %v64_v22  ;;  %542 = vmatprep.subr.mxu1 %v286_v44  ;;  %v260_v2 = vld [vmem:[#allocation2] sm:$0xff] }
  0x25   :  { %120 = vmatprep.subr.mxu0 %v63_v23  ;;  %543 = vmatpush3.msra.mxu1 %v270_v45  ;;  %v86_v6 = vld [vmem:[%s947_s2] sm:$0x3] }
  0x26   :  { %121 = vmatpush1.msra.mxu0 %v62_v24  ;;  %544 = vmatprep.subr.mxu1 %v285_v46  ;;  %v91_v8 = vrot.slane %v86_v6, %v90_v5  ;;  %v95_v9 = vrot.slane %v86_v6, %v94_v7 }
  0x27   :  { %122 = vmatprep.subr.mxu0 %v61_v25  ;;  %545 = vmatpush3.msra.mxu1 %v269_v47 }
  0x28   :  { %123 = vmatpush1.msra.mxu0 %v60_v26  ;;  %546 = vmatprep.subr.mxu1 %v284_v48  ;;  %v169_v48 = vld [vmem:[%s948_s3] sm:$0x3] }
  0x29   :  { %124 = vmatprep.subr.mxu0 %v59_v27  ;;  %547 = vmatpush3.msra.mxu1 %v268_v49  ;;  %v208_v49 = vrot.slane %v169_v48, %v90_v5 }
  0x2a   :  { %125 = vmatpush1.msra.mxu0 %v58_v28  ;;  %548 = vmatprep.subr.mxu1 %v283_v50  ;;  %v170_v50 = vld [vmem:[%s949_s4] sm:$0x3] }
  0x2b   :  { %126 = vmatprep.subr.mxu0 %v57_v29  ;;  %549 = vmatpush3.msra.mxu1 %v267_v51  ;;  %v212_v51 = vrot.slane %v169_v48, %v94_v7 }
  0x2c   :  { %127 = vmatpush1.msra.mxu0 %v56_v30  ;;  %550 = vmatprep.subr.mxu1 %v282_v52 }
  0x2d   :  { %128 = vmatprep.subr.mxu0 %v55_v31  ;;  %551 = vmatpush3.msra.mxu1 %v266_v53  ;;  %v227_v53 = vrot.slane %v170_v50, %v90_v5 }
  0x2e   :  { %129 = vmatpush1.msra.mxu0 %v54_v32  ;;  %552 = vmatprep.subr.mxu1 %v281_v54 }
  0x2f   :  { %163 = vmatmul.mubr.f32.vlgmr.msra.gmra.mxu0 %v53_v33  ;;  %584 = vmatprep.subr.mxu0 %v690_v0 }
  0x30   :  { %553 = vmatpush3.msra.mxu1 %v265_v55  ;;  %616 = vmatprep.mubr.msk.f32.mxu0 %vm691_vm2, %v690_v0 }
  0x31   :  { %554 = vmatprep.subr.mxu1 %v280_v56 }
  0x32   :  { %555 = vmatpush3.msra.mxu1 %v264_v57  ;;  %v231_v57 = vrot.slane %v170_v50, %v94_v7 }
  0x33   :  { %556 = vmatprep.subr.mxu1 %v279_v58 }
  0x34   :  { %557 = vmatpush3.msra.mxu1 %v263_v59 }
  0x35   :  { %558 = vmatprep.subr.mxu1 %v278_v60 }
  0x36   :  { %559 = vmatpush3.msra.mxu1 %v262_v61 }
  0x37   :  { %560 = vmatprep.subr.mxu1 %v277_v62 }
  0x38   :  { %561 = vmatpush3.msra.mxu1 %v261_v63 }
  0x39   :  { %562 = vmatprep.subr.mxu1 %v276_v1 }
  0x3a   :  { %563 = vmatpush3.msra.mxu1 %v260_v2 }
  0xef   :  { %v164_v10 = vpop.f32.mrf.mxu0 }
  0xf0   :  { %v165_v11 = vadd.f32 %v164_v10, %v91_v8 }
  0xf1   :  { %v166_v12 = vpop.f32.mrf.mxu0 }
  0xf2   :  { %v171_v13 = vrot.slane %v165_v11, 4  ;;  %v167_v14 = vadd.f32 %v166_v12, %v95_v9 }
  0xf4   :  { %v172_v15 = vadd.f32 %v171_v13, %v165_v11  ;;  %v177_v16 = vrot.slane %v167_v14, 4 }
  0xf6   :  { %v173_v17 = vrot.slane %v172_v15, 2  ;;  %v178_v18 = vadd.f32 %v177_v16, %v167_v14 }
  0xf8   :  { %v174_v19 = vadd.f32 %v173_v17, %v172_v15  ;;  %v179_v20 = vrot.slane %v178_v18, 2 }
  0xfa   :  { %v175_v21 = vrot.slane %v174_v19, 1  ;;  %v180_v22 = vadd.f32 %v179_v20, %v178_v18 }
  0xfc   :  { %v176_v23 = vadd.f32 %v175_v21, %v174_v19  ;;  %v181_v24 = vrot.slane %v180_v22, 1  ;;  %v431_v21 = vld [vmem:[%s954_s9 + $0x78] sm:$0xff] }
  0xfd   :  { %585 = vmatpush3.msra.mxu0 %v431_v21 }
  0xfe   :  { %v184_v25 = vmul.f32 0.125, %v176_v23  ;;  %v182_v26 = vadd.f32 %v181_v24, %v180_v22  ;;  %v430_v22 = vld [vmem:[%s954_s9 + $0x70] sm:$0xff]  ;;  %586 = vmatprep.subr.mxu0 %v690_v0  ;;  %v429_v23 = vld [vmem:[%s954_s9 + $0x68] sm:$0xff]  ;;  %v428_v24 = vld [vmem:[%s954_s9 + $0x60] sm:$0xff] }
  0xff   :  { %587 = vmatpush3.msra.mxu0 %v430_v22 }
 0x100   :  { %v186_v27 = vsub.f32 %v165_v11, %v184_v25  ;;  %v185_v28 = vmul.f32 0.125, %v182_v26  ;;  %588 = vmatprep.subr.mxu0 %v690_v0  ;;  %v427_v25 = vld [vmem:[%s954_s9 + $0x58] sm:$0xff]  ;;  %v426_v26 = vld [vmem:[%s954_s9 + $0x50] sm:$0xff] }
 0x101   :  { %589 = vmatpush3.msra.mxu0 %v429_v23 }
 0x102   :  { %v188_v29 = vmul.f32 %v186_v27, %v186_v27  ;;  %v187_v30 = vsub.f32 %v167_v14, %v185_v28  ;;  %v215_v52 = vmul.f32 %v208_v49, %v186_v27  ;;  %590 = vmatprep.subr.mxu0 %v690_v0  ;;  %v425_v27 = vld [vmem:[%s954_s9 + $0x48] sm:$0xff]  ;;  %v424_v28 = vld [vmem:[%s954_s9 + $0x40] sm:$0xff] }
 0x103   :  { %591 = vmatpush3.msra.mxu0 %v428_v24 }
 0x104   :  { %v190_v31 = vrot.slane %v188_v29, 4  ;;  %v189_v32 = vmul.f32 %v187_v30, %v187_v30  ;;  %v216_v56 = vmul.f32 %v212_v51, %v187_v30  ;;  %592 = vmatprep.subr.mxu0 %v690_v0  ;;  %v422_v30 = vld [vmem:[%s954_s9 + $0x30] sm:$0xff] }
 0x105   :  { %593 = vmatpush3.msra.mxu0 %v427_v25 }
 0x106   :  { %v191_v33 = vadd.f32 %v190_v31, %v188_v29  ;;  %v196_v34 = vrot.slane %v189_v32, 4  ;;  %594 = vmatprep.subr.mxu0 %v690_v0  ;;  %v423_v29 = vld [vmem:[%s954_s9 + $0x38] sm:$0xff]  ;;  %v421_v31 = vld [vmem:[%s954_s9 + $0x28] sm:$0xff] }
 0x107   :  { %595 = vmatpush3.msra.mxu0 %v426_v26 }
 0x108   :  { %v192_v35 = vrot.slane %v191_v33, 2  ;;  %v197_v36 = vadd.f32 %v196_v34, %v189_v32  ;;  %596 = vmatprep.subr.mxu0 %v690_v0  ;;  %v420_v32 = vld [vmem:[%s954_s9 + $0x20] sm:$0xff]  ;;  %v418_v34 = vld [vmem:[%s954_s9 + $0x10] sm:$0xff] }
 0x109   :  { %597 = vmatpush3.msra.mxu0 %v425_v27 }
 0x10a   :  { %v193_v37 = vadd.f32 %v192_v35, %v191_v33  ;;  %v198_v38 = vrot.slane %v197_v36, 2  ;;  %598 = vmatprep.subr.mxu0 %v690_v0  ;;  %v419_v33 = vld [vmem:[%s954_s9 + $0x18] sm:$0xff]  ;;  %v417_v35 = vld [vmem:[%s954_s9 + $0x8] sm:$0xff] }
 0x10b   :  { %599 = vmatpush3.msra.mxu0 %v424_v28 }
 0x10c   :  { %v194_v39 = vrot.slane %v193_v37, 1  ;;  %v199_v40 = vadd.f32 %v198_v38, %v197_v36  ;;  %600 = vmatprep.subr.mxu0 %v690_v0  ;;  %v416_v36 = vld [vmem:[%s954_s9] sm:$0xff] }
 0x10d   :  { %601 = vmatpush3.msra.mxu0 %v423_v29  ;;  %v527_v38 = vld [vmem:[%s951_s6] ss:$0 sm:$0xff] }
 0x10e   :  { %v195_v41 = vadd.f32 %v194_v39, %v193_v37  ;;  %v200_v42 = vrot.slane %v199_v40, 1  ;;  %602 = vmatprep.subr.mxu0 %v690_v0 }
 0x10f   :  { %603 = vmatpush3.msra.mxu0 %v422_v30 }
 0x110   :  { %v202_v43 = vmul.f32 0.125, %v195_v41  ;;  %v201_v44 = vadd.f32 %v200_v42, %v199_v40  ;;  %604 = vmatprep.subr.mxu0 %v690_v0 }
 0x111   :  { %605 = vmatpush3.msra.mxu0 %v421_v31 }
 0x112   :  { %v217_v45 = vadd.f32 1e-05, %v202_v43  ;;  %v203_v46 = vmul.f32 0.125, %v201_v44  ;;  %606 = vmatprep.subr.mxu0 %v690_v0 }
 0x113   :  { %607 = vmatpush3.msra.mxu0 %v420_v32 }
 0x114   :  { %625 = vrsqrt.f32 %v217_v45  ;;  %v218_v47 = vadd.f32 1e-05, %v203_v46  ;;  %608 = vmatprep.subr.mxu0 %v690_v0 }
 0x115   :  { %609 = vmatpush3.msra.mxu0 %v419_v33 }
 0x116   :  { %627 = vrsqrt.f32 %v218_v47  ;;  %610 = vmatprep.subr.mxu0 %v690_v0 }
 0x117   :  { %611 = vmatpush3.msra.mxu0 %v418_v34 }
 0x118   :  { %612 = vmatprep.subr.mxu0 %v690_v0 }
 0x119   :  { %613 = vmatpush3.msra.mxu0 %v417_v35 }
 0x11a   :  { %614 = vmatprep.subr.mxu0 %v690_v0 }
 0x11b   :  { %615 = vmatpush3.msra.mxu0 %v416_v36 }
 0x121   :  { %v626_v54 = vpop.eup %625 }
 0x122   :  { %v221_v55 = vmul.f32 %v626_v54, %v215_v52 }
 0x123   :  { %v628_v58 = vpop.eup %627 }
 0x124   :  { %v222_v59 = vmul.f32 %v628_v58, %v216_v56  ;;  %v234_v60 = vadd.f32 %v227_v53, %v221_v55  ;;  %v528_v58 = vld [vmem:[%s952_s7] ss:$0 sm:$0xff] }
 0x126   :  { %v235_v61 = vadd.f32 %v231_v57, %v222_v59  ;;  %v236_v62 = vmin.f32 %v234_v60, 20.0  ;;  %vm246_vm1 = vcmp.gt.f32.partialorder %v234_v60, 20.0 }
 0x128   :  { %v237_v63 = vmin.f32 %v235_v61, 20.0  ;;  %v238_v1 = vmul.f32 1.442695, %v236_v62  ;;  %vm247_vm0 = vcmp.gt.f32.partialorder %v235_v61, 20.0 }
 0x12a   :  { %v240_v2 = vmul.f32 1.442695, %v237_v63  ;;  %629 = vpow2.f32 %v238_v1 }
 0x12c   :  { %631 = vpow2.f32 %v240_v2 }
 0x137   :  { %v630_v3 = vpop.eup %629 }
 0x138   :  { %v242_v4 = vadd.f32 1.0, %v630_v3 }
 0x139   :  { %v632_v6 = vpop.eup %631 }
 0x13a   :  { %v243_v8 = vadd.f32 1.0, %v632_v6  ;;  %v244_v9 = vmul.f32 %v242_v4, %v242_v4 }
 0x13c   :  { %v245_v5 = vmul.f32 %v243_v8, %v243_v8  ;;  %v252_v10 = vadd.f32 1.0, %v244_v9  ;;  %v525_v7 = vadd.f32 -1.0, %v244_v9 }
 0x13e   :  { %v253_v11 = vadd.f32 1.0, %v245_v5  ;;  %633 = vrcp.f32 %v252_v10  ;;  %v526_v12 = vadd.f32 -1.0, %v245_v5  ;;  %v250_v14 = vmul.f32 %v525_v7, %v234_v60 }
 0x140   :  { %635 = vrcp.f32 %v253_v11  ;;  %v251_v15 = vmul.f32 %v526_v12, %v235_v61  ;;  %v531_v12 = vld [vmem:[%s955_s10] ss:$0 sm:$0xff] }
 0x14b   :  { %v634_v13 = vpop.eup %633 }
 0x14c   :  { %v255_v17 = vmul.f32 %v634_v13, %v250_v14 }
 0x14d   :  { %v636_v16 = vpop.eup %635 }
 0x14e   :  { %v257_v18 = vmul.f32 %v636_v16, %v251_v15  ;;  %v258_v20 = vsel %vm246_vm1, %v234_v60, %v255_v17 }
 0x150   :  { %v259_v19 = vsel %vm247_vm0, %v235_v61, %v257_v18  ;;  %v529_v61 = vld [vmem:[%s953_s8] ss:$0 sm:$0xff]  ;;  %s692_s8 = smov [#allocation5]  }
 0x151   :  { %363 = vmatprep.mubr.f32.mxu1 %v259_v19  ;;  %s516_s23 = sshll.u32 %s692_s8, 4  ;;  %s517_s23 = int_to_ptr.vmem [resolvable:$true] %s516_s23 }
 0x152   :  { %364 = vmatmul.mubr.f32.vlgmr.msra.gmra.mxu1 %v258_v20  ;;  %s663_s24 = scalar_lea.vmem %s517_s23, 128  ;;  %p668_p6 = scmp.lt.s32.totalorder %s517_s23, %s517_s23 }
 0x153   :  { %p664_p5 = scmp.ne.s32.totalorder %s517_s23, %s663_s24  ;;  %p669_p7 = scmp.lt.s32.totalorder %s663_s24, %s663_s24 }
 0x155   :  { %p670_p8 = por %p669_p7, %p668_p6 }
 0x157   :  { %p671_p9 = pnand %p670_p8, %p664_p5 }
 0x212   :  { %v564_v37 = vpop.f32.mrf.mxu1 }
 0x214   :  { %v565_v39 = vpop.f32.mrf.mxu1 }
 0x215   :  { %v566_v40 = vadd.f32 %v565_v39, %v564_v37 }
 0x217   :  { %v366_v41 = vadd.f32 %v566_v40, %v527_v38 }
 0x219   :  { %v371_v42 = vrot.slane %v366_v41, 4 }
 0x21b   :  { %v372_v43 = vadd.f32 %v371_v42, %v366_v41 }
 0x21d   :  { %v373_v44 = vrot.slane %v372_v43, 2 }
 0x21f   :  { %v374_v45 = vadd.f32 %v373_v44, %v372_v43 }
 0x221   :  { %v375_v46 = vrot.slane %v374_v45, 1 }
 0x223   :  { %v376_v47 = vadd.f32 %v375_v46, %v374_v45 }
 0x225   :  { %v377_v48 = vmul.f32 0.125, %v376_v47 }
 0x227   :  { %v378_v49 = vsub.f32 %v366_v41, %v377_v48 }
 0x229   :  { %v379_v50 = vmul.f32 %v378_v49, %v378_v49  ;;  %v393_v59 = vmul.f32 %v528_v58, %v378_v49 }
 0x22b   :  { %v380_v51 = vrot.slane %v379_v50, 4 }
 0x22d   :  { %v381_v0 = vadd.f32 %v380_v51, %v379_v50 }
 0x22f   :  { %v382_v52 = vrot.slane %v381_v0, 2 }
 0x231   :  { %v383_v53 = vadd.f32 %v382_v52, %v381_v0 }
 0x233   :  { %v384_v54 = vrot.slane %v383_v53, 1 }
 0x235   :  { %v385_v55 = vadd.f32 %v384_v54, %v383_v53 }
 0x237   :  { %v386_v56 = vmul.f32 0.125, %v385_v55 }
 0x239   :  { %v394_v57 = vadd.f32 1e-05, %v386_v56 }
 0x23b   :  { %637 = vrsqrt.f32 %v394_v57 }
 0x248   :  { %v638_v60 = vpop.eup %637 }
 0x249   :  { %v396_v62 = vmul.f32 %v638_v60, %v393_v59 }
 0x24b   :  { %v403_v63 = vadd.f32 %v529_v61, %v396_v62 }
 0x24d   :  { %v404_v1 = vmin.f32 %v403_v63, 20.0  ;;  %vm409_vm3 = vcmp.gt.f32.partialorder %v403_v63, 20.0 }
 0x24f   :  { %v405_v2 = vmul.f32 1.442695, %v404_v1 }
 0x251   :  { %639 = vpow2.f32 %v405_v2 }
 0x25e   :  { %v640_v3 = vpop.eup %639 }
 0x25f   :  { %v407_v4 = vadd.f32 1.0, %v640_v3 }
 0x261   :  { %v408_v6 = vmul.f32 %v407_v4, %v407_v4 }
 0x263   :  { %v412_v8 = vadd.f32 1.0, %v408_v6  ;;  %v530_v9 = vadd.f32 -1.0, %v408_v6 }
 0x265   :  { %641 = vrcp.f32 %v412_v8  ;;  %v411_v5 = vmul.f32 %v530_v9, %v403_v63 }
 0x272   :  { %v642_v10 = vpop.eup %641 }
 0x273   :  { %v414_v11 = vmul.f32 %v642_v10, %v411_v5 }
 0x275   :  { %v415_v7 = vsel %vm409_vm3, %v403_v63, %v414_v11 }
 0x276   :  { %617 = vmatmul.mubr.f32.vlgmr.msra.gmra.mxu0 %v415_v7 }
 0x336   :  { %v505_v13 = vpop.f32.mrf.mxu0 }
 0x337   :  { %v506_v14 = vadd.f32 %v531_v12, %v505_v13 }
 0x338   :  { %v618_v15 = vpop.f32.mrf.mxu0 }
 0x339   :  { %509 = vst [vmem:[#allocation5] sm:$0xff] %v506_v14 }
 0x33a   :  { %674 = shalt.err (!%p671_p9)
}
 0x33b   :  { %519 = dma.vmem_to_hbm [thread:$0]  %s517_s23, 128, %s956_s11, [#allocation4]  }
 0x33c   :  { %685 = dma.done.wait [#allocation4], 128  }
 0x33d   :  { %686 = vsyncadd [#allocation4], 4294967168 }
 0x33e   :  { %523 = vsyncpa [#allocation3], 1 }
 0x33f   :  { %524 = vsyncpa [#allocation4], 1 }

</bundles_post_ra>
